<compile_context>
chip_gen: v5e
topology: v5e:2x2
jax: 0.10.0
libtpu: 0.0.40
codegen_flags: <defaults>
</compile_context>

<pallas_src>
import math

import numpy as np
import jax
import jax.numpy as jnp
from jax.experimental import pallas as pl
from jax.experimental.pallas import tpu as pltpu

_A = -0.75            # PyTorch bicubic convolution coefficient
_LANE = 128
_SUBLANE = 8
_VMEM_BUDGET = 30 * 1024 * 1024   # target per-step working set (safe on v5e/v6e/v7x)


def _round_up(n, m):
    return ((n + m - 1) // m) * m


def _cubic_weights(t):
    """4-tap cubic convolution weights for fractional offsets t (vectorized)."""
    def c1(x):      # |x| <= 1
        return ((_A + 2.0) * x - (_A + 3.0)) * x * x + 1.0

    def c2(x):      # 1 < |x| < 2
        return ((_A * x - 5.0 * _A) * x + 8.0 * _A) * x - 4.0 * _A

    return (c2(t + 1.0), c1(t), c1(1.0 - t), c2(2.0 - t))


def _time_warp_matrix(T, window, key):
    """(T, T) f32 warp matrix reproducing torch `time_warp` (bicubic,
    align_corners=False, edge clamped).  Nonzeros satisfy |col - row| <= window + 2
    (band matrix), which the kernel exploits to band-limit the contraction.
    Built fully on device with vectorized jnp ops (no host syncs)."""
    if T - window <= window:
        return jnp.eye(T, dtype=jnp.float32)
    k1, k2 = jax.random.split(key)
    center = jax.random.randint(k1, (), window, T - window)                    # torch.randint(window, t-window)
    warped = jax.random.randint(k2, (), center - window, center + window) + 1  # torch.randint(c-w, c+w) + 1

    o = jnp.arange(T, dtype=jnp.int32)
    left = o < warped                                          # rows of the left resize block
    o_loc = jnp.where(left, o, o - warped).astype(jnp.float32)
    out_len = jnp.where(left, warped, T - warped).astype(jnp.float32)
    in_len = jnp.where(left, center, T - center).astype(jnp.float32)
    base = jnp.where(left, 0, center)
    in_max = jnp.where(left, center - 1, T - center - 1)

    src = (o_loc + 0.5) * (in_len / out_len) - 0.5             # align_corners=False
    i0 = jnp.floor(src)
    t_frac = src - i0
    i0 = i0.astype(jnp.int32)

    cols = jnp.arange(T, dtype=jnp.int32)[None, :]
    W = jnp.zeros((T, T), jnp.float32)
    for k, w in zip((-1, 0, 1, 2), _cubic_weights(t_frac)):
        idx = jnp.clip(i0 + k, 0, in_max) + base               # edge clamp, as torch does
        W = W + (cols == idx[:, None]).astype(jnp.float32) * w[:, None]
    return W


def _axis_keep_mask(key, B, D, width_range, num_mask):
    """Keep-mask (B, D) f32 (1=keep, 0=masked) mirroring torch mask_along_axis.
    Like torch, mask_pos uses a single high = max(1, D - mask_len.max()) over
    the whole batch; bounds stay traced so there is no device->host sync."""
    k1, k2 = jax.random.split(key)
    mask_len = jax.random.randint(k1, (B, num_mask), width_range[0], width_range[1])
    high = jnp.maximum(1, D - jnp.max(mask_len))
    mask_pos = jax.random.randint(k2, (B, num_mask), 0, high)
    aran = jnp.arange(D)[None, None, :]
    mask = (mask_pos[..., None] <= aran) & (aran < (mask_pos + mask_len)[..., None])
    mask = jnp.any(mask, axis=1)                               # (B, D)
    return 1.0 - mask.astype(jnp.float32)


# ----------------------------- Pallas kernels --------------------------------

def _warp_mask_kernel(koff_ref, w_ref, x_ref, tk_ref, m_ref, o_ref, acc_ref):
    """out[i,n] = (sum_k W[i, koff[i]+k] @ X[koff[i]+k, n]) * (tkeep[i] @ M[:, n])."""
    del koff_ref                     # consumed by the index_maps only
    k = pl.program_id(2)

    part = jnp.dot(w_ref[...], x_ref[...], preferred_element_type=jnp.float32)

    @pl.when(k == 0)
    def _first():                    # direct assign: no zero-init RMW of the acc
        acc_ref[...] = part

    @pl.when(k != 0)
    def _accumulate():
        acc_ref[...] += part

    @pl.when(k == pl.num_programs(2) - 1)
    def _finalize():
        # keep[t, b*F+f] = tkeep[t, b] * fkeep[b, f], built on the MXU from two
        # tiny bf16 operands instead of reading a full-size mask from HBM.
        keep = jnp.dot(tk_ref[...], m_ref[...], preferred_element_type=jnp.float32)
        o_ref[...] = (acc_ref[...] * keep).astype(o_ref.dtype)


def _mask_only_kernel(x_ref, tk_ref, m_ref, o_ref):
    """out[i,n] = X[i,n] * (tkeep[i] @ M[:, n]) — single mem-bound pass, no warp."""
    keep = jnp.dot(tk_ref[...], m_ref[...], preferred_element_type=jnp.float32)
    o_ref[...] = (x_ref[...].astype(jnp.float32) * keep).astype(o_ref.dtype)


def _choose_n_tile(N, tT, B_pad, x_item, out_item, use_warp):
    """Largest lane-multiple N tile whose double-buffered working set fits budget."""
    def ws(tn):
        w = (2 * tT * tn * x_item            # X tiles (double buffered)
             + 2 * tT * B_pad * 2            # tkeep (bf16)
             + 2 * B_pad * tn * 2            # M (bf16)
             + 2 * tT * tn * out_item)       # output tiles
        if use_warp:
            w += 2 * tT * tT * x_item + tT * tn * 4   # W tiles + f32 accumulator
        return w

    n_full = _round_up(N, _LANE)
    if ws(n_full) <= _VMEM_BUDGET:
        return n_full, ws(n_full)
    per_lane_blk = ws(2 * _LANE) - ws(_LANE)          # ws is affine in tn
    fixed = ws(_LANE) - per_lane_blk
    blocks = max(1, (_VMEM_BUDGET - fixed) // per_lane_blk)
    tn = min(n_full, blocks * _LANE)
    return tn, ws(tn)


# ------------------------------- wrapper --------------------------------------

def spec_aug(x, key, x_lengths=None, *,
             apply_time_warp=True, time_warp_window=5,
             apply_freq_mask=True, freq_mask_width_range=(0, 20), num_freq_mask=2,
             apply_time_mask=True, time_mask_width_range=(0, 5),
             time_mask_width_ratio_range=None, num_time_mask=2,
             matmul_dtype=jnp.bfloat16, out_dtype=None):
    """SpecAug forward: (B, T, F) or (T, F) -> (augmented spec, x_lengths).

    matmul_dtype=jnp.float32 gives bit-tighter warp numerics (band-skip keeps the
    extra MXU passes cheap); out_dtype=jnp.bfloat16 halves output traffic if the
    downstream stage tolerates it.
    """
    # TODO(synk): per-utterance time_warp for unequal x_lengths (torch pad_list
    # path) is not implemented; the batched (equal-length) warp is always used.
    # TODO(synk): callers that can keep activations in (T, B*F) layout across the
    # augmentation stage avoid the wrapper-side transpose/unpack HBM passes.
    if x.ndim == 2:
        x = x[None, ...]
    B, T, F = x.shape
    out_dtype = x.dtype if out_dtype is None else out_dtype
    kw, kf, kt = jax.random.split(key, 3)

    # torch returns x unchanged when t - window <= window -> mask-only path.
    use_warp = bool(apply_time_warp) and (T - time_warp_window > time_warp_window)

    # ---- random augmentation parameters -> small operands (all on device) ----
    fkeep = (_axis_keep_mask(kf, B, F, freq_mask_width_range, num_freq_mask)
             if apply_freq_mask else jnp.ones((B, F), jnp.float32))

    if (apply_time_mask and time_mask_width_range is None
            and time_mask_width_ratio_range is not None):
        lo = max(0, math.floor(T * time_mask_width_ratio_range[0]))
        hi = min(T, math.floor(T * time_mask_width_ratio_range[1]))
        time_mask_width_range = (lo, hi) if hi > lo else None
    do_tmask = apply_time_mask and time_mask_width_range is not None
    tkeep = (_axis_keep_mask(kt, B, T, time_mask_width_range, num_time_mask)
             if do_tmask else jnp.ones((B, T), jnp.float32))

    # ---- lane-dense packing & tiling -----------------------------------------
    N = B * F
    tT = min(256, _round_up(T, _LANE))              # lane-multiple time tile (full MXU K)
    T_pad = _round_up(T, tT)
    B_pad = _round_up(B, _SUBLANE)
    mm_item = np.dtype(matmul_dtype).itemsize
    out_item = np.dtype(out_dtype).itemsize
    x_item = np.dtype(x.dtype).itemsize

    tN, ws_bytes = _choose_n_tile(N, tT, B_pad,
                                  mm_item if use_warp else x_item,
                                  out_item, use_warp)
    N_pad = _round_up(N, tN)
    nI, nN = T_pad // tT, N_pad // tN
    # Explicit VMEM budget: covers the working set + headroom, raises v5e's 16 MiB
    # default, never exceeds v7x's 64 MiB per-TC physical VMEM.
    vmem_limit = int(min(max(32 << 20, ws_bytes + (8 << 20)), 64 << 20))

    Xr = jnp.transpose(x, (1, 0, 2)).reshape(T, N)                       # (T, B*F)

    # Fused 0/1 mask operands (exact in bf16): keep[t, b*F+f] = tkeep[b,t]*fkeep[b,f]
    onehot = (jnp.arange(B)[:, None] == (jnp.arange(N) // F)[None, :]).astype(jnp.float32)
    Mp = jnp.pad(onehot * fkeep.reshape(1, N),
                 ((0, B_pad - B), (0, N_pad - N))).astype(jnp.bfloat16)   # (B_pad, N_pad)
    Tkp = jnp.pad(tkeep.T, ((0, T_pad - T), (0, B_pad - B))).astype(jnp.bfloat16)

    if use_warp:
        W = _time_warp_matrix(T, time_warp_window, kw)
        Wp = jnp.pad(W, ((0, T_pad - T), (0, T_pad - T))).astype(matmul_dtype)
        Xp = jnp.pad(Xr, ((0, T_pad - T), (0, N_pad - N))).astype(matmul_dtype)

        # Band-limited contraction: W nonzeros satisfy |col - row| <= window + 2,
        # so row tile i only needs k-tiles [koff[i], koff[i] + nkv).
        band = time_warp_window + 4
        nK = nI
        a = -(-band // tT)                                    # ceil(band / tT)
        nkv = min(nK, 2 + (band - 1) // tT + a)               # == 3 whenever band <= tT
        koff = jnp.asarray(np.clip(np.arange(nI) - a, 0, nK - nkv), jnp.int32)

        cost = pl.CostEstimate(
            flops=2 * nI * nN * nkv * tT * tT * tN + 2 * nI * nN * tT * B_pad * tN,
            transcendentals=0,
            bytes_accessed=(nI * nN * nkv * (tT * tT + tT * tN) * mm_item
                            + T_pad * B_pad * 2 + nN * B_pad * tN * 2
                            + T_pad * N_pad * out_item))

        out = pl.pallas_call(
            _warp_mask_kernel,
            out_shape=jax.ShapeDtypeStruct((T_pad, N_pad), out_dtype),
            grid_spec=pltpu.PrefetchScalarGridSpec(
                num_scalar_prefetch=1,                      # koff -> SMEM
                grid=(nI, nN, nkv),
                in_specs=[
                    pl.BlockSpec((tT, tT), lambda i, n, k, ko: (i, ko[i] + k)),   # W band tile
                    pl.BlockSpec((tT, tN), lambda i, n, k, ko: (ko[i] + k, n)),   # X band tile
                    pl.BlockSpec((tT, B_pad), lambda i, n, k, ko: (i, 0)),        # time keep
                    pl.BlockSpec((B_pad, tN), lambda i, n, k, ko: (0, n)),        # freq expander
                ],
                out_specs=pl.BlockSpec((tT, tN), lambda i, n, k, ko: (i, n)),
                scratch_shapes=[pltpu.VMEM((tT, tN), jnp.float32)],               # f32 acc
            ),
            compiler_params=pltpu.CompilerParams(
                dimension_semantics=("parallel", "parallel", "arbitrary"),
                vmem_limit_bytes=vmem_limit),
            cost_estimate=cost,
        )(koff, Wp, Xp, Tkp, Mp)
    else:
        # Mask-only path: no T x T matmul; one elementwise pass over X.
        Xp = (jnp.pad(Xr, ((0, T_pad - T), (0, N_pad - N)))
              if (T_pad > T or N_pad > N) else Xr)
        cost = pl.CostEstimate(
            flops=2 * nI * nN * tT * B_pad * tN + T_pad * N_pad,
            transcendentals=0,
            bytes_accessed=(T_pad * N_pad * (x_item + out_item)
                            + T_pad * B_pad * 2 + nN * B_pad * tN * 2))
        out = pl.pallas_call(
            _mask_only_kernel,
            out_shape=jax.ShapeDtypeStruct((T_pad, N_pad), out_dtype),
            grid_spec=pltpu.PrefetchScalarGridSpec(
                num_scalar_prefetch=0,
                grid=(nI, nN),
                in_specs=[
                    pl.BlockSpec((tT, tN), lambda i, n: (i, n)),
                    pl.BlockSpec((tT, B_pad), lambda i, n: (i, 0)),
                    pl.BlockSpec((B_pad, tN), lambda i, n: (0, n)),
                ],
                out_specs=pl.BlockSpec((tT, tN), lambda i, n: (i, n)),
            ),
            compiler_params=pltpu.CompilerParams(
                dimension_semantics=("parallel", "parallel"),
                vmem_limit_bytes=vmem_limit),
            cost_estimate=cost,
        )(Xp, Tkp, Mp)

    y = out
    if T_pad > T or N_pad > N:
        y = y[:T, :N]
    y = y.reshape(T, B, F).transpose(1, 0, 2)                            # back to (B, T, F)
    return y, x_lengths


if __name__ == "__main__":
    key = jax.random.PRNGKey(0)
    kx, kaug = jax.random.split(key)
    B, T, F = 2, 32, 16
    x = jax.random.normal(kx, (B, T, F), dtype=jnp.float32)
    x_lengths = jnp.full((B,), T, dtype=jnp.int32)   # equal lengths -> batched time warp

    static = ("apply_time_warp", "time_warp_window",
              "apply_freq_mask", "freq_mask_width_range", "num_freq_mask",
              "apply_time_mask", "time_mask_width_range",
              "time_mask_width_ratio_range", "num_time_mask",
              "matmul_dtype", "out_dtype")
    spec_aug_jit = jax.jit(spec_aug, static_argnames=static)

    # 1) warp + freq-mask + time-mask (band-limited MXU kernel)
    y, y_lens = spec_aug_jit(
        x, kaug, x_lengths,
        apply_time_warp=True, time_warp_window=5,
        freq_mask_width_range=(0, 5), num_freq_mask=2,
        time_mask_width_range=(0, 5), num_time_mask=2)
    jax.block_until_ready(y)
    assert y.shape == x.shape and y.dtype == x.dtype

    # 2) mask-only path (elementwise kernel; also covers the identity-warp case)
    y2, _ = spec_aug_jit(
        x, kaug, x_lengths,
        apply_time_warp=False,
        freq_mask_width_range=(0, 5), num_freq_mask=2,
        time_mask_width_range=(0, 5), num_time_mask=2)
    jax.block_until_ready(y2)
    assert y2.shape == x.shape and y2.dtype == x.dtype

    print("KERNEL_OK")
</pallas_src>

<mosaic_0001>
module attributes {stable_mosaic.version = 11 : i64} {
  func.func @_warp_mask_kernel(%arg0: i32, %arg1: i32, %arg2: i32, %arg3: memref<1xi32, #tpu.memory_space<smem>>, %arg4: memref<128x128xbf16, #tpu.memory_space<vmem>>, %arg5: memref<128x128xbf16, #tpu.memory_space<vmem>>, %arg6: memref<128x8xbf16, #tpu.memory_space<vmem>>, %arg7: memref<8x128xbf16, #tpu.memory_space<vmem>>, %arg8: memref<128x128xf32, #tpu.memory_space<vmem>>, %arg9: memref<128x128xf32, #tpu.memory_space<vmem>>) attributes {dimension_semantics = [#tpu.dimension_semantics<parallel>, #tpu.dimension_semantics<parallel>, #tpu.dimension_semantics<arbitrary>], iteration_bounds = array<i64: 1, 1, 1>, scalar_prefetch = 1 : i64, scratch_operands = 1 : i64, tpu.core_type = #tpu.core_type<tc>, window_params = [{transform_indices = @transform_0, window_bounds = array<i64: 128, 128>}, {transform_indices = @transform_1, window_bounds = array<i64: 128, 128>}, {transform_indices = @transform_2, window_bounds = array<i64: 128, 8>}, {transform_indices = @transform_3, window_bounds = array<i64: 8, 128>}, {transform_indices = @transform_4, window_bounds = array<i64: 128, 128>}]} {
    %c0 = arith.constant 0 : index
    %c0_0 = arith.constant 0 : index
    %0 = vector.load %arg4[%c0, %c0_0] : memref<128x128xbf16, #tpu.memory_space<vmem>>, vector<128x128xbf16>
    %c0_1 = arith.constant 0 : index
    %c0_2 = arith.constant 0 : index
    %1 = vector.load %arg5[%c0_1, %c0_2] : memref<128x128xbf16, #tpu.memory_space<vmem>>, vector<128x128xbf16>
    %cst = arith.constant dense<0.000000e+00> : vector<128x128xf32>
    %2 = tpu.matmul %0, %1, %cst {dimension_numbers = #tpu.dot_dimension_numbers<[1], [0], [0], [1], [0, 0, 1, 1], [], []>} : vector<128x128xbf16>, vector<128x128xbf16>, vector<128x128xf32> -> vector<128x128xf32>
    %c0_i32 = arith.constant 0 : i32
    %3 = arith.cmpi eq, %arg2, %c0_i32 : i32
    %4 = arith.extui %3 : i1 to i32
    %c0_i32_3 = arith.constant 0 : i32
    %5 = arith.cmpi ne, %4, %c0_i32_3 : i32
    scf.if %5 {
      %c0_8 = arith.constant 0 : index
      %c0_9 = arith.constant 0 : index
      %12 = vector.load %arg9[%c0_8, %c0_9] : memref<128x128xf32, #tpu.memory_space<vmem>>, vector<128x128xf32>
      tpu.vector_store %arg9[%c0_8, %c0_9], %2 {strides = array<i32>} : memref<128x128xf32, #tpu.memory_space<vmem>>, vector<128x128xf32>,
    } else {
    }
    %c0_i32_4 = arith.constant 0 : i32
    %6 = arith.cmpi ne, %arg2, %c0_i32_4 : i32
    %7 = arith.extui %6 : i1 to i32
    %c0_i32_5 = arith.constant 0 : i32
    %8 = arith.cmpi ne, %7, %c0_i32_5 : i32
    scf.if %8 {
      %c0_8 = arith.constant 0 : index
      %c0_9 = arith.constant 0 : index
      %12 = vector.load %arg9[%c0_8, %c0_9] : memref<128x128xf32, #tpu.memory_space<vmem>>, vector<128x128xf32>
      %13 = arith.addf %12, %2 : vector<128x128xf32>
      %c0_10 = arith.constant 0 : index
      %c0_11 = arith.constant 0 : index
      %14 = vector.load %arg9[%c0_10, %c0_11] : memref<128x128xf32, #tpu.memory_space<vmem>>, vector<128x128xf32>
      tpu.vector_store %arg9[%c0_10, %c0_11], %13 {strides = array<i32>} : memref<128x128xf32, #tpu.memory_space<vmem>>, vector<128x128xf32>,
    } else {
    }
    %c0_i32_6 = arith.constant 0 : i32
    %9 = arith.cmpi eq, %arg2, %c0_i32_6 : i32
    %10 = arith.extui %9 : i1 to i32
    %c0_i32_7 = arith.constant 0 : i32
    %11 = arith.cmpi ne, %10, %c0_i32_7 : i32
    scf.if %11 {
      %c0_8 = arith.constant 0 : index
      %c0_9 = arith.constant 0 : index
      %12 = vector.load %arg6[%c0_8, %c0_9] : memref<128x8xbf16, #tpu.memory_space<vmem>>, vector<128x8xbf16>
      %c0_10 = arith.constant 0 : index
      %c0_11 = arith.constant 0 : index
      %13 = vector.load %arg7[%c0_10, %c0_11] : memref<8x128xbf16, #tpu.memory_space<vmem>>, vector<8x128xbf16>
      %cst_12 = arith.constant dense<0.000000e+00> : vector<128x128xf32>
      %14 = tpu.matmul %12, %13, %cst_12 {dimension_numbers = #tpu.dot_dimension_numbers<[1], [0], [0], [1], [0, 0, 1, 1], [], []>} : vector<128x8xbf16>, vector<8x128xbf16>, vector<128x128xf32> -> vector<128x128xf32>
      %c0_13 = arith.constant 0 : index
      %c0_14 = arith.constant 0 : index
      %15 = vector.load %arg9[%c0_13, %c0_14] : memref<128x128xf32, #tpu.memory_space<vmem>>, vector<128x128xf32>
      %16 = arith.mulf %15, %14 : vector<128x128xf32>
      %c0_15 = arith.constant 0 : index
      %c0_16 = arith.constant 0 : index
      %17 = vector.load %arg8[%c0_15, %c0_16] : memref<128x128xf32, #tpu.memory_space<vmem>>, vector<128x128xf32>
      tpu.vector_store %arg8[%c0_15, %c0_16], %16 {strides = array<i32>} : memref<128x128xf32, #tpu.memory_space<vmem>>, vector<128x128xf32>,
    } else {
    }
    return
  }
  func.func @transform_0(%arg0: i32, %arg1: i32, %arg2: i32, %arg3: memref<1xi32, #tpu.memory_space<smem>>) -> (i32, i32) {
    %0 = arith.index_cast %arg0 : i32 to index
    %1 = memref.load %arg3[%0] : memref<1xi32, #tpu.memory_space<smem>>
    %2 = arith.addi %1, %arg2 : i32
    %c0_i32 = arith.constant 0 : i32
    return %arg0, %2 : i32, i32
  }
  func.func @transform_1(%arg0: i32, %arg1: i32, %arg2: i32, %arg3: memref<1xi32, #tpu.memory_space<smem>>) -> (i32, i32) {
    %0 = arith.index_cast %arg0 : i32 to index
    %1 = memref.load %arg3[%0] : memref<1xi32, #tpu.memory_space<smem>>
    %2 = arith.addi %1, %arg2 : i32
    %c0_i32 = arith.constant 0 : i32
    return %2, %arg1 : i32, i32
  }
  func.func @transform_2(%arg0: i32, %arg1: i32, %arg2: i32, %arg3: memref<1xi32, #tpu.memory_space<smem>>) -> (i32, i32) {
    %c0_i32 = arith.constant 0 : i32
    %c0_i32_0 = arith.constant 0 : i32
    return %arg0, %c0_i32 : i32, i32
  }
  func.func @transform_3(%arg0: i32, %arg1: i32, %arg2: i32, %arg3: memref<1xi32, #tpu.memory_space<smem>>) -> (i32, i32) {
    %c0_i32 = arith.constant 0 : i32
    %c0_i32_0 = arith.constant 0 : i32
    return %c0_i32, %arg1 : i32, i32
  }
  func.func @transform_4(%arg0: i32, %arg1: i32, %arg2: i32, %arg3: memref<1xi32, #tpu.memory_space<smem>>) -> (i32, i32) {
    %c0_i32 = arith.constant 0 : i32
    return %arg0, %arg1 : i32, i32
  }
}

</mosaic_0001>

<bundles_post_ra>
// kernel: spec_aug.3
= control target key start
LH: loop header
LB: loop body
LE: loop exit
PB: predicated region body
PF: predicated region fallthrough
CT: control target
= control target key end

     0   :  { %vm403_vm0 = vcmask 1043456   ;;  %vm378_vm1 = vcmask 64512   ;;  %s798_s4 = inlined_call_operand.vmem [shape: bf16[8,128], index: 4, kind: input, shape index: {}]   ;;  %s799_s3 = inlined_call_operand.vmem [shape: bf16[128,8], index: 3, kind: input, shape index: {}]   ;;  %s800_s0 = inlined_call_operand.<no memory space> [shape: s32[1], index: 0, kind: input, shape index: {}]   ;;  %s801_s2 = inlined_call_operand.vmem [shape: bf16[128,128], index: 2, kind: input, shape index: {}]   ;;  %s802_s1 = inlined_call_operand.vmem [shape: bf16[128,128], index: 1, kind: input, shape index: {}]   ;;  %s803_s5 = inlined_call_operand.vmem [shape: f32[128,128], index: 5, kind: output, shape index: {}]  }
   0x1   :  { %v337_v0 = vld [vmem:[%s798_s4] sm:$0xf]  ;;  %s521_s22 = sshll.u32 %s800_s0, 4  ;;  %v648_v5 = vld [vmem:[%s799_s3 + $0x28] sm:$0xff]  ;;  %p52_p1 = scmp.lt.s32.totalorder %s800_s0, 0  ;;  %v649_v11 = vld [vmem:[%s799_s3 + $0x30] sm:$0xff] }
   0x2   :  { %v405_v1 = vsel %vm403_vm0, %v337_v0, 0  ;;  %v643_v2 = vld [vmem:[%s799_s3] sm:$0xff]  ;;  %p61_p0 = scmp.lt.s32.totalorder %s521_s22, 15  ;;  %v644_v7 = vld [vmem:[%s799_s3 + $0x8] sm:$0xff]  ;;  %v645_v13 = vld [vmem:[%s799_s3 + $0x10] sm:$0xff] }
   0x3   :  { %414 = vmatpush.bf16.msra.mxu1 %v405_v1  ;;  %659 = vmatpush.bf16.msra.mxu3 %v405_v1  ;;  %s807_s0 = smov (!%p52_p1, %s800_s0), 0  ;;  %v650_v17 = vld [vmem:[%s799_s3 + $0x38] sm:$0xff]  ;;  %v647_v21 = vld [vmem:[%s799_s3 + $0x20] sm:$0xff] }
   0x4   :  { %s805_s22 = smov (!%p61_p0, %s521_s22), 15  ;;  %s520_s12 = sshll.u32 %s807_s0, 2  ;;  %v646_v18 = vld [vmem:[%s799_s3 + $0x18] sm:$0xff] }
   0x5   :  { %s522_s25 = sshll.u32 %s805_s22, 2  ;;  %s55_s17 = scalar_lea.vmem %s802_s1, %s520_s12 }
   0x6   :  { %619 = vmatmul.msk.bf16.vlgmr.msra.gmra.mxu1 %vm378_vm1, %v643_v2  ;;  %s703_s4 = scalar_lea.vmem %s801_s2, %s522_s25  ;;  %624 = vmatmul.msk.bf16.vlgmr.msra.gmra.mxu3 %vm378_vm1, %v648_v5  ;;  %v627_v15 = vld [vmem:[%s55_s17] sm:$0xff]  ;;  %v628_v19 = vld [vmem:[%s55_s17 + $0x8] sm:$0xff]  ;;  %v629_v22 = vld [vmem:[%s55_s17 + $0x10] sm:$0xff] }
   0x7   :  { %v642_v3 = vld [vmem:[%s703_s4 + $0x38] sm:$0xff]  ;;  %v641_v4 = vld [vmem:[%s703_s4 + $0x30] sm:$0xff]  ;;  %v640_v6 = vld [vmem:[%s703_s4 + $0x28] sm:$0xff] }
   0x8   :  { %197 = vmatpush.bf16.msra.mxu0 %v642_v3  ;;  %651 = vmatpush.bf16.msra.mxu2 %v642_v3  ;;  %v639_v8 = vld [vmem:[%s703_s4 + $0x20] sm:$0xff]  ;;  %v638_v9 = vld [vmem:[%s703_s4 + $0x18] sm:$0xff]  ;;  %v637_v10 = vld [vmem:[%s703_s4 + $0x10] sm:$0xff] }
   0x9   :  { %v636_v12 = vld [vmem:[%s703_s4 + $0x8] sm:$0xff]  ;;  %v635_v14 = vld [vmem:[%s703_s4] sm:$0xff]  ;;  %v633_v23 = vld [vmem:[%s55_s17 + $0x30] sm:$0xff] }
   0xa   :  { %v631_v16 = vld [vmem:[%s55_s17 + $0x20] sm:$0xff]  ;;  %v632_v20 = vld [vmem:[%s55_s17 + $0x28] sm:$0xff]  ;;  %v630_v24 = vld [vmem:[%s55_s17 + $0x18] sm:$0xff] }
   0xb   :  { %v634_v25 = vld [vmem:[%s55_s17 + $0x38] sm:$0xff] }
   0xc   :  { %198 = vmatpush.bf16.msra.mxu0 %v641_v4  ;;  %652 = vmatpush.bf16.msra.mxu2 %v641_v4 }
  0x10   :  { %199 = vmatpush.bf16.msra.mxu0 %v640_v6  ;;  %653 = vmatpush.bf16.msra.mxu2 %v640_v6 }
  0x14   :  { %200 = vmatpush.bf16.msra.mxu0 %v639_v8  ;;  %654 = vmatpush.bf16.msra.mxu2 %v639_v8 }
  0x16   :  { %620 = vmatmul.msk.bf16.gmra.mxu1 %vm378_vm1, %v644_v7  ;;  %625 = vmatmul.msk.bf16.gmra.mxu3 %vm378_vm1, %v649_v11 }
  0x18   :  { %201 = vmatpush.bf16.msra.mxu0 %v638_v9  ;;  %655 = vmatpush.bf16.msra.mxu2 %v638_v9 }
  0x1c   :  { %202 = vmatpush.bf16.msra.mxu0 %v637_v10  ;;  %656 = vmatpush.bf16.msra.mxu2 %v637_v10 }
  0x20   :  { %203 = vmatpush.bf16.msra.mxu0 %v636_v12  ;;  %657 = vmatpush.bf16.msra.mxu2 %v636_v12 }
  0x24   :  { %204 = vmatpush.bf16.msra.mxu0 %v635_v14  ;;  %658 = vmatpush.bf16.msra.mxu2 %v635_v14 }
  0x26   :  { %621 = vmatmul.msk.bf16.gmra.mxu1 %vm378_vm1, %v645_v13  ;;  %626 = vmatmul.msk.bf16.gmra.mxu3 %vm378_vm1, %v650_v17 }
  0x27   :  { %205 = vmatmul.bf16.vlgmr.msra.gmra.mxu0 %v627_v15  ;;  %225 = vmatmul.bf16.vlgmr.msra.gmra.mxu2 %v631_v16 }
  0x36   :  { %622 = vmatmul.msk.bf16.gmra.mxu1 %vm378_vm1, %v646_v18 }
  0x37   :  { %210 = vmatmul.bf16.gmra.mxu0 %v628_v19  ;;  %230 = vmatmul.bf16.gmra.mxu2 %v632_v20 }
  0x46   :  { %623 = vmatmul.msk.bf16.gmra.mxu1 %vm378_vm1, %v647_v21 }
  0x47   :  { %215 = vmatmul.bf16.gmra.mxu0 %v629_v22  ;;  %235 = vmatmul.bf16.gmra.mxu2 %v633_v23 }
  0x57   :  { %220 = vmatmul.bf16.gmra.mxu0 %v630_v24  ;;  %240 = vmatmul.bf16.gmra.mxu2 %v634_v25 }
  0x83   :  { %v416_v26 = vpop.f32.mrf.mxu1 }
  0x89   :  { %v441_v38 = vpop.f32.mrf.mxu3 }
  0x8b   :  { %v418_v27 = vpop.f32.mrf.mxu1 }
  0x91   :  { %v443_v44 = vpop.f32.mrf.mxu3 }
  0x93   :  { %v421_v28 = vpop.f32.mrf.mxu1 }
  0x99   :  { %v446_v53 = vpop.f32.mrf.mxu3 }
  0x9b   :  { %v423_v29 = vpop.f32.mrf.mxu1 }
  0xa1   :  { %v448_v61 = vpop.f32.mrf.mxu3 }
  0xa3   :  { %v426_v30 = vpop.f32.mrf.mxu1 }
  0xa4   :  { %v206_v31 = vpop.f32.mrf.mxu0 }
  0xa5   :  { %v472_v32 = vmul.f32 %v416_v26, %v206_v31 }
  0xa7   :  { %488 = vst [vmem:[%s803_s5] sm:$0xff] %v472_v32 }
  0xa9   :  { %v451_v2 = vpop.f32.mrf.mxu3 }
  0xaa   :  { %v226_v34 = vpop.f32.mrf.mxu2 }
  0xab   :  { %v428_v33 = vpop.f32.mrf.mxu1 }
  0xac   :  { %v208_v35 = vpop.f32.mrf.mxu0 }
  0xad   :  { %v473_v36 = vmul.f32 %v418_v27, %v208_v35 }
  0xaf   :  { %489 = vst [vmem:[%s803_s5 + $0x8] sm:$0xff] %v473_v36 }
  0xb1   :  { %v453_v7 = vpop.f32.mrf.mxu3 }
  0xb2   :  { %v228_v39 = vpop.f32.mrf.mxu2 }
  0xb3   :  { %v431_v37 = vpop.f32.mrf.mxu1 }
  0xb4   :  { %v211_v40 = vpop.f32.mrf.mxu0 }
  0xb5   :  { %v474_v41 = vmul.f32 %v421_v28, %v211_v40 }
  0xb7   :  { %490 = vst [vmem:[%s803_s5 + $0x10] sm:$0xff] %v474_v41 }
  0xba   :  { %v231_v43 = vpop.f32.mrf.mxu2 }
  0xbb   :  { %v433_v42 = vpop.f32.mrf.mxu1  ;;  %v482_v45 = vmul.f32 %v441_v38, %v231_v43 }
  0xbc   :  { %v213_v46 = vpop.f32.mrf.mxu0 }
  0xbd   :  { %v475_v47 = vmul.f32 %v423_v29, %v213_v46  ;;  %498 = vst [vmem:[%s803_s5 + $0x50] sm:$0xff] %v482_v45 }
  0xbf   :  { %491 = vst [vmem:[%s803_s5 + $0x18] sm:$0xff] %v475_v47 }
  0xc2   :  { %v233_v50 = vpop.f32.mrf.mxu2 }
  0xc3   :  { %v436_v48 = vpop.f32.mrf.mxu1  ;;  %v483_v51 = vmul.f32 %v443_v44, %v233_v50 }
  0xc4   :  { %v480_v49 = vmul.f32 %v436_v48, %v226_v34  ;;  %v216_v52 = vpop.f32.mrf.mxu0 }
  0xc5   :  { %v476_v54 = vmul.f32 %v426_v30, %v216_v52  ;;  %499 = vst [vmem:[%s803_s5 + $0x58] sm:$0xff] %v483_v51 }
  0xc6   :  { %496 = vst [vmem:[%s803_s5 + $0x40] sm:$0xff] %v480_v49 }
  0xc7   :  { %492 = vst [vmem:[%s803_s5 + $0x20] sm:$0xff] %v476_v54 }
  0xca   :  { %v236_v57 = vpop.f32.mrf.mxu2 }
  0xcb   :  { %v438_v55 = vpop.f32.mrf.mxu1  ;;  %v484_v58 = vmul.f32 %v446_v53, %v236_v57 }
  0xcc   :  { %v481_v56 = vmul.f32 %v438_v55, %v228_v39  ;;  %v218_v59 = vpop.f32.mrf.mxu0 }
  0xcd   :  { %v477_v60 = vmul.f32 %v428_v33, %v218_v59  ;;  %500 = vst [vmem:[%s803_s5 + $0x60] sm:$0xff] %v484_v58 }
  0xce   :  { %497 = vst [vmem:[%s803_s5 + $0x48] sm:$0xff] %v481_v56 }
  0xcf   :  { %493 = vst [vmem:[%s803_s5 + $0x28] sm:$0xff] %v477_v60 }
  0xd2   :  { %v238_v62 = vpop.f32.mrf.mxu2 }
  0xd3   :  { %v485_v63 = vmul.f32 %v448_v61, %v238_v62 }
  0xd4   :  { %v221_v0 = vpop.f32.mrf.mxu0 }
  0xd5   :  { %v478_v1 = vmul.f32 %v431_v37, %v221_v0  ;;  %501 = vst [vmem:[%s803_s5 + $0x68] sm:$0xff] %v485_v63 }
  0xd7   :  { %494 = vst [vmem:[%s803_s5 + $0x30] sm:$0xff] %v478_v1 }
  0xda   :  { %v241_v3 = vpop.f32.mrf.mxu2 }
  0xdb   :  { %v486_v4 = vmul.f32 %v451_v2, %v241_v3 }
  0xdc   :  { %v223_v5 = vpop.f32.mrf.mxu0 }
  0xdd   :  { %v479_v6 = vmul.f32 %v433_v42, %v223_v5  ;;  %502 = vst [vmem:[%s803_s5 + $0x70] sm:$0xff] %v486_v4 }
  0xdf   :  { %495 = vst [vmem:[%s803_s5 + $0x38] sm:$0xff] %v479_v6 }
  0xe2   :  { %v243_v8 = vpop.f32.mrf.mxu2 }
  0xe3   :  { %v487_v9 = vmul.f32 %v453_v7, %v243_v8 }
  0xe5   :  { %503 = vst [vmem:[%s803_s5 + $0x78] sm:$0xff] %v487_v9 }

</bundles_post_ra>
